<compile_context>
chip_gen: v6e
topology: v6e:2x2x1
jax: 0.10.0
libtpu: 0.0.40
codegen_flags: <defaults>
</compile_context>

<pallas_src>
import functools

import jax
import jax.numpy as jnp
from jax import lax
from jax.experimental import pallas as pl
from jax.experimental.pallas import tpu as pltpu


def _round_up(x, m):
    return ((x + m - 1) // m) * m


def _addnorm_kernel(x_ref, y_ref, gamma_ref, beta_ref, o_ref, *, eps, hidden):
    # residual add (dropout == identity in eval mode), accumulate in f32
    z = y_ref[...].astype(jnp.float32) + x_ref[...].astype(jnp.float32)
    h_pad = z.shape[-1]

    inv_h = 1.0 / hidden
    # Padded lanes of x/y are zero, so sum(z) over the padded tile is already
    # the sum over the true `hidden` lanes.
    mean = jnp.sum(z, axis=-1, keepdims=True) * inv_h
    cent = z - mean
    if h_pad != hidden:
        lane = lax.broadcasted_iota(jnp.int32, z.shape, dimension=z.ndim - 1)
        cent = jnp.where(lane < hidden, cent, 0.0)
    var = jnp.sum(cent * cent, axis=-1, keepdims=True) * inv_h
    inv = lax.rsqrt(var + eps)                       # EUP slot, effectively free

    # fused affine: scale = inv * gamma (gamma already f32 from the wrapper)
    scale = inv * gamma_ref[...]
    o_ref[...] = (cent * scale + beta_ref[...]).astype(o_ref.dtype)


def add_norm(X, Y, gamma, beta, *, eps=1e-5, row_tile=None):
    """out = LayerNorm(Y + X) over the last dim, parameterized by gamma/beta."""
    assert X.shape == Y.shape
    H = X.shape[-1]
    assert gamma.shape == (H,) and beta.shape == (H,)

    rows = 1
    for d in X.shape[:-1]:
        rows *= d

    itemsize = jnp.dtype(X.dtype).itemsize
    sublane = {4: 8, 2: 16, 1: 32}.get(itemsize, 8)
    H_pad = _round_up(H, 128)

    # --- row_tile selection: VMEM-budgeted, sublane-aligned ------------------
    if row_tile is None:
        # ~3 MiB per block per array -> 3 arrays x 2 buffers ~= 18 MiB of DMA
        # buffers, leaving headroom for f32 intermediates on every generation
        # (including v7x's 64 MiB-per-TC VMEM).
        target_block_bytes = 3 * 1024 * 1024
        row_tile = max(sublane, target_block_bytes // (H_pad * itemsize))
    row_tile = max(sublane, (row_tile // sublane) * sublane)
    # never larger than the (sublane-rounded) problem
    row_tile = min(row_tile, _round_up(rows, sublane))

    rows_pad = _round_up(rows, row_tile)
    grid = (rows_pad // row_tile,)

    # --- pad to lane-dense / tile-aligned shapes ------------------------------
    x2 = X.reshape(rows, H)
    y2 = Y.reshape(rows, H)
    pad_r = rows_pad - rows
    pad_h = H_pad - H
    if pad_r or pad_h:
        x2 = jnp.pad(x2, ((0, pad_r), (0, pad_h)))
        y2 = jnp.pad(y2, ((0, pad_r), (0, pad_h)))
    g2 = jnp.pad(gamma.astype(jnp.float32), (0, pad_h)).reshape(1, H_pad)
    b2 = jnp.pad(beta.astype(jnp.float32), (0, pad_h)).reshape(1, H_pad)

    kernel = functools.partial(_addnorm_kernel, eps=eps, hidden=H)

    out2 = pl.pallas_call(
        kernel,
        out_shape=jax.ShapeDtypeStruct((rows_pad, H_pad), X.dtype),
        grid_spec=pltpu.PrefetchScalarGridSpec(
            num_scalar_prefetch=0,
            grid=grid,
            in_specs=[
                pl.BlockSpec((row_tile, H_pad), lambda i: (i, 0)),  # X tile
                pl.BlockSpec((row_tile, H_pad), lambda i: (i, 0)),  # Y tile
                pl.BlockSpec((1, H_pad), lambda i: (0, 0)),         # gamma (resident)
                pl.BlockSpec((1, H_pad), lambda i: (0, 0)),         # beta  (resident)
            ],
            out_specs=pl.BlockSpec((row_tile, H_pad), lambda i: (i, 0)),
        ),
        compiler_params=pltpu.CompilerParams(
            dimension_semantics=("parallel",),      # megacore-sharded on v7x
            vmem_limit_bytes=48 * 1024 * 1024,      # > v5e/v6e scoped default,
                                                    # < v7x 64 MiB physical
        ),
    )(x2, y2, g2, b2)

    if pad_r or pad_h:
        out2 = out2[:rows, :H]
    return out2.reshape(X.shape)


def _reference_add_norm(X, Y, gamma, beta, eps=1e-5):
    z = (Y + X).astype(jnp.float32)
    mean = jnp.mean(z, axis=-1, keepdims=True)
    var = jnp.mean((z - mean) ** 2, axis=-1, keepdims=True)
    out = (z - mean) / jnp.sqrt(var + eps) * gamma + beta
    return out.astype(X.dtype)


if __name__ == "__main__":
    # Small shapes consistent with AddNorm usage in a transformer:
    # (batch=2, seq=8, hidden=32), normalized_shape = hidden = 32.
    # (Note: H=32 pads to 128 lanes in-kernel; typical transformer H is already
    #  a multiple of 128 and pays no padding cost.)
    batch, seq, hidden = 2, 8, 32
    dropout_p = 0.1  # unused at inference (eval mode -> identity)

    key = jax.random.PRNGKey(0)
    kx, ky = jax.random.split(key)
    X = jax.random.normal(kx, (batch, seq, hidden), dtype=jnp.float32)
    Y = jax.random.normal(ky, (batch, seq, hidden), dtype=jnp.float32)

    # LayerNorm parameters: PyTorch default init (weight=1, bias=0), deterministic.
    gamma = jnp.ones((hidden,), dtype=jnp.float32)
    beta = jnp.zeros((hidden,), dtype=jnp.float32)

    out = add_norm(X, Y, gamma, beta)
    out = jax.block_until_ready(out)

    ref = _reference_add_norm(X, Y, gamma, beta)
    assert out.shape == X.shape
    assert jnp.max(jnp.abs(out - ref)) < 1e-4, "mismatch vs. pure-JAX reference"

    print("KERNEL_OK")
</pallas_src>

<mosaic_0001>
module attributes {stable_mosaic.version = 11 : i64} {
  func.func @_addnorm_kernel(%arg0: i32, %arg1: memref<16x128xf32, #tpu.memory_space<vmem>>, %arg2: memref<16x128xf32, #tpu.memory_space<vmem>>, %arg3: memref<1x128xf32, #tpu.memory_space<vmem>>, %arg4: memref<1x128xf32, #tpu.memory_space<vmem>>, %arg5: memref<16x128xf32, #tpu.memory_space<vmem>>) attributes {dimension_semantics = [#tpu.dimension_semantics<parallel>], iteration_bounds = array<i64: 1>, scalar_prefetch = 0 : i64, scratch_operands = 0 : i64, tpu.core_type = #tpu.core_type<tc>, window_params = [{transform_indices = @transform_0, window_bounds = array<i64: 16, 128>}, {transform_indices = @transform_1, window_bounds = array<i64: 16, 128>}, {pipeline_mode = #tpu.pipeline_mode<synchronous>, transform_indices = @transform_2, window_bounds = array<i64: 1, 128>}, {pipeline_mode = #tpu.pipeline_mode<synchronous>, transform_indices = @transform_3, window_bounds = array<i64: 1, 128>}, {transform_indices = @transform_4, window_bounds = array<i64: 16, 128>}]} {
    %c0 = arith.constant 0 : index
    %c0_0 = arith.constant 0 : index
    %0 = vector.load %arg2[%c0, %c0_0] : memref<16x128xf32, #tpu.memory_space<vmem>>, vector<16x128xf32>
    %c0_1 = arith.constant 0 : index
    %c0_2 = arith.constant 0 : index
    %1 = vector.load %arg1[%c0_1, %c0_2] : memref<16x128xf32, #tpu.memory_space<vmem>>, vector<16x128xf32>
    %2 = arith.addf %0, %1 : vector<16x128xf32>
    %cst = arith.constant dense<0.000000e+00> : vector<16xf32>
    %3 = vector.multi_reduction <add>, %2, %cst [1] : vector<16x128xf32> to vector<16xf32>
    %4 = vector.shape_cast %3 : vector<16xf32> to vector<16x1xf32>
    %cst_3 = arith.constant 3.125000e-02 : f32
    %5 = vector.broadcast %cst_3 : f32 to vector<16x1xf32>
    %6 = arith.mulf %4, %5 : vector<16x1xf32>
    %7 = vector.broadcast %6 : vector<16x1xf32> to vector<16x128xf32>
    %8 = arith.subf %2, %7 : vector<16x128xf32>
    %9 = tpu.iota {dimensions = array<i32: 1>} : vector<16x128xi32>
    %c32_i32 = arith.constant 32 : i32
    %10 = vector.broadcast %c32_i32 : i32 to vector<16x128xi32>
    %11 = arith.cmpi slt, %9, %10 : vector<16x128xi32>
    %cst_4 = arith.constant 0.000000e+00 : f32
    %12 = vector.broadcast %cst_4 : f32 to vector<16x128xf32>
    %13 = arith.select %11, %8, %12 : vector<16x128xi1>, vector<16x128xf32>
    %14 = arith.mulf %13, %13 : vector<16x128xf32>
    %cst_5 = arith.constant dense<0.000000e+00> : vector<16xf32>
    %15 = vector.multi_reduction <add>, %14, %cst_5 [1] : vector<16x128xf32> to vector<16xf32>
    %16 = vector.shape_cast %15 : vector<16xf32> to vector<16x1xf32>
    %cst_6 = arith.constant 3.125000e-02 : f32
    %17 = vector.broadcast %cst_6 : f32 to vector<16x1xf32>
    %18 = arith.mulf %16, %17 : vector<16x1xf32>
    %cst_7 = arith.constant 9.99999974E-6 : f32
    %19 = vector.broadcast %cst_7 : f32 to vector<16x1xf32>
    %20 = arith.addf %18, %19 : vector<16x1xf32>
    %21 = math.rsqrt %20 : vector<16x1xf32>
    %c0_8 = arith.constant 0 : index
    %c0_9 = arith.constant 0 : index
    %22 = vector.load %arg3[%c0_8, %c0_9] : memref<1x128xf32, #tpu.memory_space<vmem>>, vector<1x128xf32>
    %23 = vector.broadcast %21 : vector<16x1xf32> to vector<16x128xf32>
    %24 = vector.broadcast %22 : vector<1x128xf32> to vector<16x128xf32>
    %25 = arith.mulf %23, %24 : vector<16x128xf32>
    %26 = arith.mulf %13, %25 : vector<16x128xf32>
    %c0_10 = arith.constant 0 : index
    %c0_11 = arith.constant 0 : index
    %27 = vector.load %arg4[%c0_10, %c0_11] : memref<1x128xf32, #tpu.memory_space<vmem>>, vector<1x128xf32>
    %28 = vector.broadcast %27 : vector<1x128xf32> to vector<16x128xf32>
    %29 = arith.addf %26, %28 : vector<16x128xf32>
    %c0_12 = arith.constant 0 : index
    %c0_13 = arith.constant 0 : index
    %30 = vector.load %arg5[%c0_12, %c0_13] : memref<16x128xf32, #tpu.memory_space<vmem>>, vector<16x128xf32>
    tpu.vector_store %arg5[%c0_12, %c0_13], %29 {strides = array<i32>} : memref<16x128xf32, #tpu.memory_space<vmem>>, vector<16x128xf32>,
    return
  }
  func.func @transform_0(%arg0: i32) -> (i32, i32) {
    %c0_i32 = arith.constant 0 : i32
    %c0_i32_0 = arith.constant 0 : i32
    return %arg0, %c0_i32 : i32, i32
  }
  func.func @transform_1(%arg0: i32) -> (i32, i32) {
    %c0_i32 = arith.constant 0 : i32
    %c0_i32_0 = arith.constant 0 : i32
    return %arg0, %c0_i32 : i32, i32
  }
  func.func @transform_2(%arg0: i32) -> (i32, i32) {
    %c0_i32 = arith.constant 0 : i32
    %c0_i32_0 = arith.constant 0 : i32
    %c0_i32_1 = arith.constant 0 : i32
    return %c0_i32, %c0_i32_0 : i32, i32
  }
  func.func @transform_3(%arg0: i32) -> (i32, i32) {
    %c0_i32 = arith.constant 0 : i32
    %c0_i32_0 = arith.constant 0 : i32
    %c0_i32_1 = arith.constant 0 : i32
    return %c0_i32, %c0_i32_0 : i32, i32
  }
  func.func @transform_4(%arg0: i32) -> (i32, i32) {
    %c0_i32 = arith.constant 0 : i32
    %c0_i32_0 = arith.constant 0 : i32
    return %arg0, %c0_i32 : i32, i32
  }
}

</mosaic_0001>

<bundles_post_ra>
// kernel: tpu_custom_call.1
= control target key start
LH: loop header
LB: loop body
LE: loop exit
PB: predicated region body
PF: predicated region fallthrough
CT: control target
= control target key end

     0   :  { %9 = vsyncpa [#allocation3], 0  ;;  %s248_s0 = inlined_call_operand.hbm [shape: f32[16,128], index: 0, kind: input, shape index: {}]   ;;  %s249_s1 = inlined_call_operand.hbm [shape: f32[16,128], index: 1, kind: input, shape index: {}]   ;;  %s250_s2 = inlined_call_operand.vmem [shape: f32[1,128], index: 2, kind: input, shape index: {}]   ;;  %s251_s3 = inlined_call_operand.vmem [shape: f32[1,128], index: 3, kind: input, shape index: {}]   ;;  %s252_s4 = inlined_call_operand.hbm [shape: f32[16,128], index: 4, kind: output, shape index: {}]  }
   0x1   :  { %10 = vsyncpa [#allocation6], 0 }
   0x2   :  { %11 = vsyncpa [#allocation4], 0  ;;  %s194_s15 = smov [#allocation2]  }
   0x3   :  { %s17_s16 = sshll.u32 %s194_s15, 4  ;;  %s18_s16 = int_to_ptr.vmem [resolvable:$true] %s17_s16 }
   0x4   :  { %s136_s17 = scalar_lea.vmem %s18_s16, 256  ;;  %p141_p1 = scmp.lt.s32.totalorder %s18_s16, %s18_s16 }
   0x5   :  { %p137_p0 = scmp.ne.s32.totalorder %s18_s16, %s136_s17  ;;  %p142_p2 = scmp.lt.s32.totalorder %s136_s17, %s136_s17 }
   0x7   :  { %p143_p3 = por %p142_p2, %p141_p1 }
   0x9   :  { %p144_p4 = pnand %p143_p3, %p137_p0 }
   0xb   :  { %147 = shalt.err (!%p144_p4)
}
   0xc   :  { %s195_s18 = smov 128   ;;  %s196_s19 = smov 8  }
   0xd   :  { %23 = dma.hbm_to_vmem [thread:$0]  %s248_s0, 256, %s18_s16, [#allocation3], %s195_s18, %s195_s18, %s196_s19  }
   0xe   :  { %s197_s22 = smov [#allocation5]  }
   0xf   :  { %s29_s23 = sshll.u32 %s197_s22, 4  ;;  %s30_s23 = int_to_ptr.vmem [resolvable:$true] %s29_s23 }
  0x10   :  { %s156_s24 = scalar_lea.vmem %s30_s23, 256  ;;  %p161_p6 = scmp.lt.s32.totalorder %s30_s23, %s30_s23 }
  0x11   :  { %p157_p5 = scmp.ne.s32.totalorder %s30_s23, %s156_s24  ;;  %p162_p7 = scmp.lt.s32.totalorder %s156_s24, %s156_s24 }
  0x13   :  { %p163_p8 = por %p162_p7, %p161_p6 }
  0x15   :  { %p164_p9 = pnand %p163_p8, %p157_p5 }
  0x17   :  { %167 = shalt.err (!%p164_p9)
}
  0x18   :  { %35 = dma.hbm_to_vmem [thread:$0]  %s249_s1, 256, %s30_s23, [#allocation6], %s195_s18, %s195_s18, %s196_s19  }
  0x19   :  { %188 = dma.done.wait [#allocation3], 256  }
  0x1a   :  { %189 = vsyncadd [#allocation3], 4294967040 }
  0x1b   :  { %190 = dma.done.wait [#allocation6], 256  }
  0x1c   :  { %191 = vsyncadd [#allocation6], 4294967040  ;;  %v46_v0 = vld [vmem:[#allocation5] sm:$0xff]  ;;  %v48_v1 = vld [vmem:[#allocation2] sm:$0xff]  ;;  %v60_v6 = vlaneseq  ;;  %s198_s29 = smov [#allocation7]  }
  0x1d   :  { %v47_v2 = vld [vmem:[#allocation5 + $0x8] sm:$0xff]  ;;  %v50_v3 = vadd.f32 %v48_v1, %v46_v0  ;;  %v49_v4 = vld [vmem:[#allocation2 + $0x8] sm:$0xff]  ;;  %v117_v24 = vld [vmem:[%s250_s2] ss:$0 sm:$0xff]  ;;  %s104_s30 = sshll.u32 %s198_s29, 4  ;;  %s105_s30 = int_to_ptr.vmem [resolvable:$true] %s104_s30 }
  0x1e   :  { %v51_v5 = vadd.f32 %v49_v4, %v47_v2  ;;  %v61_v7 = vand.u32 127, %v60_v6  ;;  %v118_v27 = vld [vmem:[%s251_s3] ss:$0 sm:$0xff]  ;;  %s168_s5 = scalar_lea.vmem %s105_s30, 256  ;;  %p173_p11 = scmp.lt.s32.totalorder %s105_s30, %s105_s30 }
  0x1f   :  { %52 = vadd.xlane.f32.xlu0 %v50_v3  ;;  %p169_p10 = scmp.ne.s32.totalorder %s105_s30, %s168_s5  ;;  %p174_p12 = scmp.lt.s32.totalorder %s168_s5, %s168_s5 }
  0x20   :  { %vm62_vm0 = vcmp.lt.s32.totalorder %v61_v7, 32 }
  0x21   :  { %p175_p13 = por %p174_p12, %p173_p11 }
  0x23   :  { %54 = vadd.xlane.f32.xlu0 %v51_v5  ;;  %p176_p0 = pnand %p175_p13, %p169_p10 }
  0xa8   :  { %v53_v8 = vpop.xlane.xlu0 %52 }
  0xa9   :  { %v56_v9 = vmul.f32 0.03125, %v53_v8 }
  0xab   :  { %v58_v10 = vsub.f32 %v50_v3, %v56_v9 }
  0xac   :  { %v55_v11 = vpop.xlane.xlu0 %54 }
  0xad   :  { %v57_v12 = vmul.f32 0.03125, %v55_v11  ;;  %v63_v13 = vsel %vm62_vm0, %v58_v10, 0.0 }
  0xae   :  { %v65_v14 = vmul.f32 %v63_v13, %v63_v13 }
  0xaf   :  { %v59_v15 = vsub.f32 %v51_v5, %v57_v12 }
  0xb0   :  { %67 = vadd.xlane.f32.xlu1 %v65_v14 }
  0xb1   :  { %v64_v16 = vsel %vm62_vm0, %v59_v15, 0.0 }
  0xb2   :  { %v66_v17 = vmul.f32 %v64_v16, %v64_v16 }
  0xb4   :  { %69 = vadd.xlane.f32.xlu1 %v66_v17 }
 0x139   :  { %v68_v18 = vpop.xlane.xlu1 %67 }
 0x13a   :  { %v71_v19 = vmul.f32 0.03125, %v68_v18 }
 0x13c   :  { %v73_v20 = vadd.f32 1e-05, %v71_v19 }
 0x13d   :  { %v70_v21 = vpop.xlane.xlu1 %69 }
 0x13e   :  { %124 = vrsqrt.f32 %v73_v20  ;;  %v72_v22 = vmul.f32 0.03125, %v70_v21 }
 0x140   :  { %v74_v23 = vadd.f32 1e-05, %v72_v22 }
 0x142   :  { %126 = vrsqrt.f32 %v74_v23 }
 0x14b   :  { %v125_v25 = vpop.eup %124 }
 0x14c   :  { %v84_v26 = vmul.f32 %v125_v25, %v117_v24 }
 0x14e   :  { %v86_v28 = vmul.f32 %v84_v26, %v63_v13 }
 0x14f   :  { %v127_v29 = vpop.eup %126 }
 0x150   :  { %v85_v30 = vmul.f32 %v127_v29, %v117_v24  ;;  %v95_v31 = vadd.f32 %v118_v27, %v86_v28 }
 0x152   :  { %v87_v32 = vmul.f32 %v85_v30, %v64_v16  ;;  %97 = vst [vmem:[#allocation7] sm:$0xff] %v95_v31 }
 0x154   :  { %v96_v33 = vadd.f32 %v118_v27, %v87_v32 }
 0x156   :  { %98 = vst [vmem:[#allocation7 + $0x8] sm:$0xff] %v96_v33 }
 0x157   :  { %179 = shalt.err (!%p176_p0)
}
 0x158   :  { %110 = dma.vmem_to_hbm [thread:$0]  %s105_s30, 256, %s252_s4, [#allocation4], %s195_s18, %s195_s18, %s196_s19  }
 0x159   :  { %192 = dma.done.wait [#allocation4], 256  }
 0x15a   :  { %193 = vsyncadd [#allocation4], 4294967040 }
 0x15b   :  { %114 = vsyncpa [#allocation3], 1 }
 0x15c   :  { %115 = vsyncpa [#allocation6], 1 }
 0x15d   :  { %116 = vsyncpa [#allocation4], 1 }

</bundles_post_ra>
